<compile_context>
chip_gen: v7x
topology: tpu7x:2x2x1
jax: 0.10.0
libtpu: 0.0.40
codegen_flags: <defaults>
</compile_context>

<pallas_src>
import math

import jax
import jax.numpy as jnp
from jax.experimental import pallas as pl
from jax.experimental.pallas import tpu as pltpu


def _banded_copy_kernel(tab_ref, o_ref):
    # All addressing is done by the BlockSpec index maps; each grid step just
    # moves one pre-gathered (T, T*n_dims) slab into its output tile.
    o_ref[...] = tab_ref[...]


def _choose_tiling(seq_len, n_dims, tile=None, *, max_tile=256,
                   vmem_budget_bytes=20 * 1024 * 1024):
    """Pick the tile size T and padded length Lp (a multiple of T).

    T must be a multiple of q = max(8, 128 // gcd(n_dims, 128)) so that the
    lane-dense (T, T*n_dims) blocks satisfy the TPU (8, 128) block rules, and
    double-buffered in+out f32 blocks must fit a conservative VMEM budget
    (safe on v5e / v6e / v7x default scoped-VMEM limits)."""
    q = max(8, 128 // math.gcd(n_dims, 128))

    if tile is not None:
        T = int(tile)
        assert T % q == 0, (T, q)
        Lp = -(-seq_len // T) * T
        return T, Lp

    # Largest T (multiple of q) within the VMEM budget (2x in + 2x out, f32).
    t_cap = int(math.isqrt(max(vmem_budget_bytes // (16 * n_dims), q * q)))
    t_cap = max(q, (min(t_cap, max_tile) // q) * q)

    # Prefer an exact divisor of seq_len (zero padding).
    for t in range(t_cap, 0, -q):
        if seq_len % t == 0:
            return t, seq_len

    # Otherwise pad minimally: smallest number of tiles, smallest padded tile.
    n_tiles = -(-seq_len // t_cap)
    T = -(-(-(-seq_len // n_tiles)) // q) * q      # round_up(ceil(L/n), q)
    return T, n_tiles * T


def relative_position_embedding(seq_len, weight, bias, *, ridx_max=32, tile=None):
    """weight: (n_dims, 2*ridx_max+1), bias: (n_dims,). Returns (1, L, L, n_dims) f32."""
    n_dims, nbins = weight.shape
    assert nbins == 2 * ridx_max + 1, (weight.shape, ridx_max)

    T, Lp = _choose_tiling(seq_len, n_dims, tile)
    assert Lp % T == 0 and Lp >= seq_len, (seq_len, T, Lp)
    G = Lp // T

    # Bias folded into the lookup table (exact: one-hot rows sum to 1).
    table = (jnp.asarray(weight, jnp.float32).T
             + jnp.asarray(bias, jnp.float32)[None, :])               # (nbins, n_dims)

    # Output tile (bi, bj) equals slab(db) with db = bi - bj + (G - 1):
    #   slab(db)[r, c*n_dims + d] = table[clip((G-1-db)*T + c - r, -R, R) + R, d]
    # Slabs with db <= G-1-m are entirely clipped high (all identical) and slabs
    # with db >= G-1+m are entirely clipped low (all identical), where
    # m = ceil((R + T - 1) / T).  Only db in [c_lo, c_hi] is materialized; the
    # index_map clamps every out-of-band tile onto the nearest constant slab.
    m = (ridx_max + 2 * T - 2) // T            # ceil((ridx_max + T - 1) / T)
    c_lo = max(0, G - 1 - m)
    c_hi = min(2 * G - 2, G - 1 + m)
    nb = c_hi - c_lo + 1

    db = jnp.arange(c_lo, c_hi + 1)                                   # (nb,)
    rr = jnp.arange(T)
    cc = jnp.arange(T)
    rel = (G - 1 - db)[:, None, None] * T + cc[None, None, :] - rr[None, :, None]
    bins = jnp.clip(rel, -ridx_max, ridx_max) + ridx_max              # (nb, T, T)
    band_tab = table[bins].reshape(nb * T, T * n_dims)                # (nb*T, T*nd)

    def tab_index_map(bi, bj):
        return (jnp.clip(bi - bj + (G - 1), c_lo, c_hi) - c_lo, 0)

    out2d = pl.pallas_call(
        _banded_copy_kernel,
        out_shape=jax.ShapeDtypeStruct((Lp, Lp * n_dims), jnp.float32),
        grid_spec=pltpu.PrefetchScalarGridSpec(
            num_scalar_prefetch=0,
            grid=(G, G),
            in_specs=[pl.BlockSpec((T, T * n_dims), tab_index_map)],
            out_specs=pl.BlockSpec((T, T * n_dims), lambda bi, bj: (bi, bj)),
        ),
        compiler_params=pltpu.CompilerParams(
            dimension_semantics=("parallel", "parallel"),
            vmem_limit_bytes=32 * 1024 * 1024,
        ),
    )(band_tab)

    # (Lp, Lp*n_dims) row-major is bit-identical to (Lp, Lp, n_dims); free reshape.
    out = out2d.reshape(Lp, Lp, n_dims)
    if Lp != seq_len:
        # TODO(synk): for non-divisible L this crop costs one extra HBM pass;
        # could be avoided with masked partial output blocks inside the kernel.
        out = out[:seq_len, :seq_len]
    return out[None]


def _reference(seq_len, weight, bias, ridx_max):
    idxs = jnp.arange(seq_len)
    ridx = jnp.clip(idxs[None, :] - idxs[:, None], -ridx_max, ridx_max) + ridx_max
    onht = jnp.eye(2 * ridx_max + 1, dtype=jnp.float32)[ridx]
    return (onht @ jnp.asarray(weight, jnp.float32).T
            + jnp.asarray(bias, jnp.float32))[None]


if __name__ == "__main__":
    key = jax.random.PRNGKey(0)
    k1, k2, k3, k4, k5, k6 = jax.random.split(key, 6)

    # Test 1: module defaults (ridx_max=32), small L -> single-tile grid.
    L1, ND1, R1 = 16, 32, 32
    w1 = jax.random.normal(k1, (ND1, 2 * R1 + 1), jnp.float32) * 0.02
    b1 = jax.random.normal(k2, (ND1,), jnp.float32) * 0.02
    out1 = jax.block_until_ready(relative_position_embedding(L1, w1, b1, ridx_max=R1))
    ref1 = _reference(L1, w1, b1, R1)
    assert out1.shape == (1, L1, L1, ND1), out1.shape
    assert jnp.allclose(out1, ref1, atol=1e-5, rtol=1e-5), "test1 mismatch"

    # Test 2: multi-tile grid with a narrow band (ridx_max=4) so the clamped
    # constant-slab fast path and the in-band slabs are both exercised.
    L2, ND2, R2 = 64, 32, 4
    w2 = jax.random.normal(k3, (ND2, 2 * R2 + 1), jnp.float32) * 0.02
    b2 = jax.random.normal(k4, (ND2,), jnp.float32) * 0.02
    out2 = jax.block_until_ready(
        relative_position_embedding(L2, w2, b2, ridx_max=R2, tile=8))
    ref2 = _reference(L2, w2, b2, R2)
    assert out2.shape == (1, L2, L2, ND2), out2.shape
    assert jnp.allclose(out2, ref2, atol=1e-5, rtol=1e-5), "test2 mismatch"

    # Test 3: non-divisible sequence length (pad + crop path), multi-tile.
    L3, ND3, R3 = 50, 32, 8
    w3 = jax.random.normal(k5, (ND3, 2 * R3 + 1), jnp.float32) * 0.02
    b3 = jax.random.normal(k6, (ND3,), jnp.float32) * 0.02
    out3 = jax.block_until_ready(
        relative_position_embedding(L3, w3, b3, ridx_max=R3, tile=8))
    ref3 = _reference(L3, w3, b3, R3)
    assert out3.shape == (1, L3, L3, ND3), out3.shape
    assert jnp.allclose(out3, ref3, atol=1e-5, rtol=1e-5), "test3 mismatch"

    print("KERNEL_OK")
</pallas_src>

<mosaic_0001>
module attributes {stable_mosaic.version = 11 : i64} {
  func.func @_banded_copy_kernel(%arg0: i32, %arg1: i32, %arg2: memref<16x512xf32, #tpu.memory_space<vmem>>, %arg3: memref<16x512xf32, #tpu.memory_space<vmem>>) attributes {dimension_semantics = [#tpu.dimension_semantics<parallel>, #tpu.dimension_semantics<parallel>], iteration_bounds = array<i64: 1, 1>, scalar_prefetch = 0 : i64, scratch_operands = 0 : i64, tpu.core_type = #tpu.core_type<tc>, window_params = [{transform_indices = @transform_0, window_bounds = array<i64: 16, 512>}, {transform_indices = @transform_1, window_bounds = array<i64: 16, 512>}]} {
    %c0 = arith.constant 0 : index
    %c0_0 = arith.constant 0 : index
    %0 = vector.load %arg2[%c0, %c0_0] : memref<16x512xf32, #tpu.memory_space<vmem>>, vector<16x512xf32>
    %c0_1 = arith.constant 0 : index
    %c0_2 = arith.constant 0 : index
    %1 = vector.load %arg3[%c0_1, %c0_2] : memref<16x512xf32, #tpu.memory_space<vmem>>, vector<16x512xf32>
    tpu.vector_store %arg3[%c0_1, %c0_2], %0 {strides = array<i32>} : memref<16x512xf32, #tpu.memory_space<vmem>>, vector<16x512xf32>,
    return
  }
  func.func @transform_0(%arg0: i32, %arg1: i32) -> (i32, i32) {
    %0 = arith.subi %arg0, %arg1 : i32
    %c0_i32 = arith.constant 0 : i32
    %1 = arith.addi %0, %c0_i32 : i32
    %c0_i32_0 = arith.constant 0 : i32
    %c0_i32_1 = arith.constant 0 : i32
    %2 = arith.maxsi %c0_i32_0, %1 : i32
    %3 = arith.minsi %c0_i32_1, %2 : i32
    %c0_i32_2 = arith.constant 0 : i32
    %4 = arith.subi %3, %c0_i32_2 : i32
    %c0_i32_3 = arith.constant 0 : i32
    %c0_i32_4 = arith.constant 0 : i32
    return %4, %c0_i32_3 : i32, i32
  }
  func.func @transform_1(%arg0: i32, %arg1: i32) -> (i32, i32) {
    %c0_i32 = arith.constant 0 : i32
    return %arg0, %arg1 : i32, i32
  }
}

</mosaic_0001>

<bundles_post_ra>
// kernel: tpu_custom_call.1
= control target key start
LH: loop header
LB: loop body
LE: loop exit
PB: predicated region body
PF: predicated region fallthrough
CT: control target
= control target key end

     0   :  { %6 = vsyncpa [#allocation3], 0  ;;  %s169_s0 = inlined_call_operand.hbm [shape: f32[16,512], index: 0, kind: input, shape index: {}]   ;;  %s170_s1 = inlined_call_operand.hbm [shape: f32[16,512], index: 1, kind: output, shape index: {}]  }
   0x1   :  { %7 = vsyncpa [#allocation4], 0  ;;  %s125_s6 = smov [#allocation2]   ;;  %s77_s10 = scalar_lea.hbm %s169_s0, 1024 }
   0x2   :  { %s22_s7 = sshll.u32 %s125_s6, 4  ;;  %p78_p0 = scmp.ne.s32.totalorder %s169_s0, %s77_s10  ;;  %s23_s7 = int_to_ptr.vmem [resolvable:$true] %s22_s7 }
   0x3   :  { %p81_p1 = scmp.lt.u32.totalorder %s77_s10, %s169_s0 }
   0x5   :  { %p83_p2 = pnand %p81_p1, %p78_p0 }
   0x7   :  { %86 = shalt.err (!%p83_p2)
}
   0x8   :  { %s87_s15 = scalar_lea.vmem %s23_s7, 1024  ;;  %p92_p4 = scmp.lt.s32.totalorder %s23_s7, %s23_s7 }
   0x9   :  { %p88_p3 = scmp.ne.s32.totalorder %s23_s7, %s87_s15  ;;  %p93_p5 = scmp.lt.s32.totalorder %s87_s15, %s87_s15 }
   0xb   :  { %p94_p6 = por %p93_p5, %p92_p4 }
   0xd   :  { %p95_p7 = pnand %p94_p6, %p88_p3 }
   0xf   :  { %98 = shalt.err (!%p95_p7)
}
  0x10   :  { %s126_s16 = smov 512   ;;  %s127_s17 = smov 32  }
  0x11   :  { %28 = dma.hbm_to_vmem [thread:$0]  %s169_s0, 1024, %s23_s7, [#allocation3], %s126_s16, %s126_s16, %s127_s17  }
  0x12   :  { %121 = dma.done.wait [#allocation3], 1024  }
  0x13   :  { %122 = vsyncadd [#allocation3], 4294966272  ;;  %s128_s20 = smov [#allocation5]   ;;  %v38_v0 = vld [vmem:[#allocation2] sm:$0xff]  ;;  %v39_v1 = vld [vmem:[#allocation2 + $0x8] sm:$0xff] }
  0x14   :  { %s59_s21 = sshll.u32 %s128_s20, 4  ;;  %v40_v2 = vld [vmem:[#allocation2 + $0x10] sm:$0xff]  ;;  %46 = vst [vmem:[#allocation5] sm:$0xff] %v38_v0  ;;  %47 = vst [vmem:[#allocation5 + $0x8] sm:$0xff] %v39_v1  ;;  %v41_v3 = vld [vmem:[#allocation2 + $0x18] sm:$0xff]  ;;  %s60_s21 = int_to_ptr.vmem [resolvable:$true] %s59_s21 }
  0x15   :  { %48 = vst [vmem:[#allocation5 + $0x10] sm:$0xff] %v40_v2  ;;  %v42_v4 = vld [vmem:[#allocation2 + $0x20] sm:$0xff]  ;;  %v43_v5 = vld [vmem:[#allocation2 + $0x28] sm:$0xff]  ;;  %49 = vst [vmem:[#allocation5 + $0x18] sm:$0xff] %v41_v3  ;;  %s99_s0 = scalar_lea.vmem %s60_s21, 1024  ;;  %p104_p9 = scmp.lt.s32.totalorder %s60_s21, %s60_s21 }
  0x16   :  { %50 = vst [vmem:[#allocation5 + $0x20] sm:$0xff] %v42_v4  ;;  %51 = vst [vmem:[#allocation5 + $0x28] sm:$0xff] %v43_v5  ;;  %v44_v6 = vld [vmem:[#allocation2 + $0x30] sm:$0xff]  ;;  %v45_v7 = vld [vmem:[#allocation2 + $0x38] sm:$0xff]  ;;  %p100_p8 = scmp.ne.s32.totalorder %s60_s21, %s99_s0  ;;  %p105_p10 = scmp.lt.s32.totalorder %s99_s0, %s99_s0 }
  0x17   :  { %52 = vst [vmem:[#allocation5 + $0x30] sm:$0xff] %v44_v6  ;;  %53 = vst [vmem:[#allocation5 + $0x38] sm:$0xff] %v45_v7 }
  0x18   :  { %p106_p11 = por %p105_p10, %p104_p9 }
  0x1a   :  { %p107_p12 = pnand %p106_p11, %p100_p8 }
  0x1c   :  { %110 = shalt.err (!%p107_p12)
}
  0x1d   :  { %s111_s24 = scalar_lea.hbm %s170_s1, 1024 }
  0x1e   :  { %p112_p13 = scmp.ne.s32.totalorder %s170_s1, %s111_s24  ;;  %p115_p0 = scmp.lt.u32.totalorder %s111_s24, %s170_s1 }
  0x20   :  { %p117_p1 = pnand %p115_p0, %p112_p13 }
  0x22   :  { %120 = shalt.err (!%p117_p1)
}
  0x23   :  { %65 = dma.vmem_to_hbm [thread:$0]  %s60_s21, 1024, %s170_s1, [#allocation4], %s126_s16, %s126_s16, %s127_s17  }
  0x24   :  { %123 = dma.done.wait [#allocation4], 1024  }
  0x25   :  { %124 = vsyncadd [#allocation4], 4294966272 }
  0x26   :  { %69 = vsyncpa [#allocation3], 1 }
  0x27   :  { %70 = vsyncpa [#allocation4], 1 }

</bundles_post_ra>
